<compile_context>
chip_gen: v7x
topology: tpu7x:2x2x1
jax: 0.10.0
libtpu: 0.0.40
codegen_flags: <defaults>
</compile_context>

<pallas_src>
import functools

import numpy as np
import jax
import jax.numpy as jnp
from jax.experimental import pallas as pl
from jax.experimental.pallas import tpu as pltpu


def _cos_m_theta(c, m):
    """cos(m*theta) as a polynomial in cos(theta) (static m in [0, 5])."""
    if m == 0:
        return jnp.ones_like(c)
    if m == 1:
        return c
    c2 = c * c
    if m == 2:
        return 2.0 * c2 - 1.0
    if m == 3:
        return (4.0 * c2 - 3.0) * c
    if m == 4:
        return (8.0 * c2 - 8.0) * c2 + 1.0
    if m == 5:
        return ((16.0 * c2 - 20.0) * c2 + 5.0) * c
    raise ValueError("m must be in [0, 5]")


# Lane columns of the packed per-row state scratch.
_XLEN, _IXLEN, _RMAX, _RSUM, _RLOG = 0, 1, 2, 3, 4


def _angle_softmax_kernel(scale_ref, x_ref, w_ref, y_ref, out_ref,
                          wn_ref, st_ref, *, m, tile_n, tile_c, pad_cols,
                          x_resident):
    c = pl.program_id(0)          # class-tile index (outer, carries row state)
    i = pl.program_id(1)          # batch-tile index (inner)
    last_c = pl.num_programs(0) - 1

    # ---- once per class tile: row-normalize the weight tile (f32 math) and
    #      cache it in VMEM in the streaming dtype for reuse by all batch tiles.
    @pl.when(i == 0)
    def _():
        w32 = w_ref[...].astype(jnp.float32)
        inv_wl = jax.lax.rsqrt(
            jnp.maximum(jnp.sum(w32 * w32, axis=1, keepdims=True), 1e-30))
        wn_ref[...] = (w32 * inv_wl).astype(wn_ref.dtype)

    # ---- batch tile of x (sliced from the resident slab, or streamed) ----
    if x_resident:
        row0 = pl.multiple_of(i * tile_n, tile_n)
        x_tile = x_ref[pl.ds(row0, tile_n), :]
    else:
        x_tile = x_ref[...]

    lane = jax.lax.broadcasted_iota(jnp.int32, (tile_n, 128), 1)

    # ---- once per batch tile (first class step): ||x|| and state init ----
    @pl.when(c == 0)
    def _():
        x32 = x_tile.astype(jnp.float32)
        x_sq = jnp.maximum(jnp.sum(x32 * x32, axis=1, keepdims=True), 1e-30)
        inv = jax.lax.rsqrt(x_sq)
        row = jnp.where(lane == _XLEN, x_sq * inv,          # ||x||
              jnp.where(lane == _IXLEN, inv,                # 1/||x||
              jnp.where(lane == _RMAX, -jnp.inf, 0.0)))     # max / sum / logit
        st_ref[i] = row

    st = st_ref[i]                                          # (TN, 128)
    xlen = st[:, _XLEN:_XLEN + 1]                           # (TN, 1)
    ixlen = st[:, _IXLEN:_IXLEN + 1]
    m_prev = st[:, _RMAX:_RMAX + 1]
    s_prev = st[:, _RSUM:_RSUM + 1]
    rlog_prev = st[:, _RLOG:_RLOG + 1]

    # ---- raw logits on the MXU (streaming dtype in, f32 accumulate) ----
    raw = jax.lax.dot_general(
        x_tile, wn_ref[...], dimension_numbers=(((1,), (1,)), ((), ())),
        preferred_element_type=jnp.float32)                 # (TN, TC)
    # feat == cos(theta) * ||x|| with cos clipped to [-1, 1]   (fused clip)
    feat = jnp.clip(raw, -xlen, xlen)

    # ---- label column restricted to this class tile ----
    y_loc = y_ref[...] - c * tile_c                         # (TN, 1) int32
    in_tile = jnp.logical_and(y_loc >= 0, y_loc < tile_c)   # (TN, 1) bool
    has_label = in_tile.astype(jnp.float32)
    onehot = jax.lax.broadcasted_iota(jnp.int32, feat.shape, 1) == y_loc
    feat_y = jnp.sum(jnp.where(onehot, feat, 0.0), axis=1, keepdims=True)

    # ---- A-Softmax margin on the (TN, 1) label column only ----
    cos_y = jnp.clip(feat_y * ixlen, -1.0, 1.0)
    cos_m_y = _cos_m_theta(cos_y, m)
    k = jnp.zeros_like(cos_y)
    sign = jnp.ones_like(cos_y)
    # k = floor(m * acos(cos)/pi) via interval thresholds; sign = (-1)^k.
    for q in range(1, m + 1):
        ind = (cos_y <= float(np.cos(q * np.pi / m))).astype(jnp.float32)
        k = k + ind
        sign = sign * (1.0 - 2.0 * ind)
    phi_y = sign * cos_m_y - 2.0 * k
    scale = scale_ref[0]                                    # 1/(1+lambda), runtime
    adj_y = feat_y + has_label * (phi_y * xlen - feat_y) * scale

    # ---- online log-sum-exp; margin folded in on the label column only ----
    def lse_update(f):
        m_new = jnp.maximum(
            jnp.maximum(m_prev, jnp.max(f, axis=1, keepdims=True)),
            jnp.where(in_tile, adj_y, -jnp.inf))
        s_new = (jnp.exp(m_prev - m_new) * s_prev
                 + jnp.sum(jnp.exp(f - m_new), axis=1, keepdims=True)
                 + has_label * (jnp.exp(adj_y - m_new) - jnp.exp(feat_y - m_new)))
        rlog_new = rlog_prev + has_label * adj_y
        st_ref[i] = jnp.where(lane == _RMAX, m_new,
                    jnp.where(lane == _RSUM, s_new,
                    jnp.where(lane == _RLOG, rlog_new, st)))

    if pad_cols == 0:
        lse_update(feat)
    else:
        # Only the last class tile contains padded class columns.
        @pl.when(c != last_c)
        def _():
            lse_update(feat)

        @pl.when(c == last_c)
        def _():
            col = jax.lax.broadcasted_iota(jnp.int32, (1, tile_c), 1)
            pad_bias = jnp.where(col < (tile_c - pad_cols), 0.0, -jnp.inf)
            lse_update(feat + pad_bias)

    # ---- epilogue: per-row -log p(label) on the final class step only ----
    @pl.when(c == last_c)
    def _():
        fin = st_ref[i]
        out_ref[...] = (fin[:, _RMAX:_RMAX + 1]
                        + jnp.log(fin[:, _RSUM:_RSUM + 1])
                        - fin[:, _RLOG:_RLOG + 1])


def _round_up(v, mult):
    return (v + mult - 1) // mult * mult


def angle_softmax_loss(x, weight, y, *, m=4, lambda_max=1000.0, lambda_min=5.0,
                       power=1.0, gamma=0.1, it=0, loss_weight=1.0,
                       tile_n=128, tile_c=512, x_resident=None,
                       x_resident_budget=8 << 20):
    """Training-mode AngleSoftmax forward.  Returns the scalar loss."""
    N, D = x.shape
    C, D_w = weight.shape
    assert D == D_w

    # lambda schedule evaluated with jnp so a changing `it` does NOT retrace /
    # recompile; it reaches the kernel as a runtime SMEM scalar (1/(1+lambda)).
    it_f = jnp.asarray(it, jnp.float32)
    lamb = jnp.maximum(lambda_min, lambda_max / (1.0 + gamma * it_f) ** power)
    scale = (1.0 / (1.0 + lamb)).reshape(1).astype(jnp.float32)

    TN = min(int(tile_n), _round_up(N, 8))
    TC = min(int(tile_c), _round_up(C, 128))
    Dp = _round_up(D, 128)
    Np = _round_up(N, TN)
    Cp = _round_up(C, TC)
    n_tiles = Np // TN
    c_tiles = Cp // TC
    pad_cols = Cp - C

    xp = jnp.pad(x, ((0, Np - N), (0, Dp - D)))
    wp = jnp.pad(weight, ((0, Cp - C), (0, Dp - D)))
    yp = jnp.pad(y.reshape(-1, 1).astype(jnp.int32), ((0, Np - N), (0, 0)))

    # Keep the full x slab resident in VMEM when it is small: x HBM traffic
    # drops from N*D*c_tiles to N*D (the dominant win for large class counts).
    if x_resident is None:
        x_resident = (Np * Dp * xp.dtype.itemsize) <= x_resident_budget
    if x_resident:
        x_spec = pl.BlockSpec((Np, Dp), lambda c, i, s: (0, 0))
    else:
        x_spec = pl.BlockSpec((TN, Dp), lambda c, i, s: (i, 0))

    kernel = functools.partial(
        _angle_softmax_kernel, m=int(m), tile_n=TN, tile_c=TC,
        pad_cols=int(pad_cols), x_resident=bool(x_resident))

    # Rough VMEM budget -> only raise the scoped limit when actually needed.
    est = ((2 * Np if x_resident else 2 * TN) * Dp * xp.dtype.itemsize
           + 3 * TC * Dp * wp.dtype.itemsize          # dbl-buffered w + wn scratch
           + n_tiles * TN * 128 * 4                   # packed per-row state
           + 6 * TN * TC * 4                          # (TN, TC) f32 temporaries
           + (1 << 20))
    vmem_limit = None if est <= (30 << 20) else min(int(est * 1.25), 64 << 20)

    per_row = pl.pallas_call(
        kernel,
        out_shape=jax.ShapeDtypeStruct((Np, 1), jnp.float32),
        grid_spec=pltpu.PrefetchScalarGridSpec(
            num_scalar_prefetch=1,                    # -> `scale` lands in SMEM
            # classes OUTER / batch INNER: each normalized weight tile is built
            # once and reused across every batch tile before the next is fetched.
            grid=(c_tiles, n_tiles),
            in_specs=[
                x_spec,                                            # x
                pl.BlockSpec((TC, Dp), lambda c, i, s: (c, 0)),    # weight
                pl.BlockSpec((TN, 1), lambda c, i, s: (i, 0)),     # labels
            ],
            out_specs=pl.BlockSpec((TN, 1), lambda c, i, s: (i, 0)),
            scratch_shapes=[
                pltpu.VMEM((TC, Dp), wp.dtype),               # normalized w tile
                pltpu.VMEM((n_tiles, TN, 128), jnp.float32),  # packed row state
            ]),
        compiler_params=pltpu.CompilerParams(
            # Class axis carries the online-softmax state; batch axis is kept
            # "arbitrary" too (see TODO above re: v7x megacore).
            dimension_semantics=("arbitrary", "arbitrary"),
            vmem_limit_bytes=vmem_limit,
        ),
    )(scale, xp, wp, yp)

    # mean over the real rows (padded rows carry garbage) + loss weight
    return jnp.sum(per_row[:N, 0]) * (float(loss_weight) / float(N))


# ----------------------------- references ----------------------------------

_MLAMBDA = [
    lambda x: jnp.ones_like(x),
    lambda x: x,
    lambda x: 2.0 * x ** 2 - 1.0,
    lambda x: 4.0 * x ** 3 - 3.0 * x,
    lambda x: 8.0 * x ** 4 - 8.0 * x ** 2 + 1.0,
    lambda x: 16.0 * x ** 5 - 20.0 * x ** 3 + 5.0 * x,
]


def _reference_loss(x, weight, y, *, m, lamb, loss_weight, mirror_kernel_matmul):
    """Pure-JAX mirror of the PyTorch forward.

    mirror_kernel_matmul=True reproduces the kernel's operand handling (f32 row
    norms, operands cast back to the streaming dtype for the matmul, wlen == 1)
    so the comparison isolates kernel logic from bf16 operand rounding.
    """
    x32 = x.astype(jnp.float32)
    w32 = weight.astype(jnp.float32)
    C = weight.shape[0]
    wl = jnp.sqrt(jnp.sum(w32 ** 2, axis=1, keepdims=True))
    wn32 = w32 / wl
    xlen = jnp.sqrt(jnp.sum(x32 ** 2, axis=1, keepdims=True))
    if mirror_kernel_matmul:
        raw = jax.lax.dot_general(
            x, wn32.astype(weight.dtype),
            dimension_numbers=(((1,), (1,)), ((), ())),
            preferred_element_type=jnp.float32)
        cos_theta = jnp.clip(raw / xlen, -1.0, 1.0)
    else:
        wlen = jnp.sqrt(jnp.sum(wn32 ** 2, axis=1)).reshape(1, -1)
        cos_theta = jnp.clip(x32 @ wn32.T / xlen / wlen, -1.0, 1.0)
    cos_m_theta = _MLAMBDA[m](cos_theta)
    k = jnp.floor(m * jnp.arccos(cos_theta) / np.pi)
    phi_theta = (1.0 - 2.0 * jnp.mod(k, 2.0)) * cos_m_theta - 2.0 * k
    feat = cos_theta * xlen
    phi = phi_theta * xlen
    onehot = jax.nn.one_hot(y, C, dtype=jnp.float32)
    feat = feat + onehot * (phi - feat) / (1.0 + lamb)
    logp = jax.nn.log_softmax(feat, axis=1)
    loss = -jnp.mean(jnp.sum(logp * onehot, axis=1))
    return loss * loss_weight


if __name__ == "__main__":
    # Small shapes that still exercise the tiling: batch 20, features 96,
    # 300 classes -> batch, feature and class padding are all in play.
    N, D, C = 20, 96, 300
    key = jax.random.PRNGKey(0)
    kx, kw, ky = jax.random.split(key, 3)

    x = jax.random.normal(kx, (N, D), dtype=jnp.float32)
    bound = float(np.sqrt(3.0 / D))            # kaiming_uniform_(a=1.0)
    weight = jax.random.uniform(kw, (C, D), minval=-bound, maxval=bound,
                                dtype=jnp.float32)
    y = jax.random.randint(ky, (N,), 0, C, dtype=jnp.int32)

    # Stream bf16 operands (norms in f32 inside the kernel, MXU accumulates f32).
    x_bf16 = x.astype(jnp.bfloat16)
    w_bf16 = weight.astype(jnp.bfloat16)

    # it=0 -> lambda = lambda_max = 1000 (margin nearly disabled); small tiles
    # force 3 class tiles x 3 batch tiles: online-softmax, hoisted weight norm,
    # resident-x slicing and last-tile class masking are all exercised.
    loss0 = jax.block_until_ready(
        angle_softmax_loss(x_bf16, w_bf16, y, m=4, it=0, loss_weight=1.0,
                           tile_n=8, tile_c=128))
    ref0 = _reference_loss(x_bf16, w_bf16, y, m=4, lamb=1000.0, loss_weight=1.0,
                           mirror_kernel_matmul=True)
    np.testing.assert_allclose(np.asarray(loss0), np.asarray(ref0),
                               rtol=5e-3, atol=5e-3)

    # Large `it` -> lambda = lambda_min = 5 (margin fully active); default tiles
    # (single class / batch tile) and the streamed-x fallback path.
    it_big = 10_000
    lamb_big = max(5.0, 1000.0 / (1.0 + 0.1 * it_big) ** 1.0)
    loss1 = jax.block_until_ready(
        angle_softmax_loss(x_bf16, w_bf16, y, m=4, it=it_big, loss_weight=0.5,
                           x_resident=False))
    ref1 = _reference_loss(x_bf16, w_bf16, y, m=4, lamb=lamb_big, loss_weight=0.5,
                           mirror_kernel_matmul=True)
    np.testing.assert_allclose(np.asarray(loss1), np.asarray(ref1),
                               rtol=5e-3, atol=5e-3)

    # Sanity check vs. the exact f32 PyTorch-style math (bf16 streaming adds
    # ~1e-2-level differences, hence the looser tolerance).
    ref_f32 = _reference_loss(x, weight, y, m=4, lamb=1000.0, loss_weight=1.0,
                              mirror_kernel_matmul=False)
    np.testing.assert_allclose(np.asarray(loss0), np.asarray(ref_f32),
                               rtol=5e-2, atol=5e-2)

    print("KERNEL_OK")
</pallas_src>

<mosaic_0001>
module attributes {stable_mosaic.version = 11 : i64} {
  func.func @_angle_softmax_kernel(%arg0: i32, %arg1: i32, %arg2: memref<1xf32, #tpu.memory_space<smem>>, %arg3: memref<24x128xbf16, #tpu.memory_space<vmem>>, %arg4: memref<128x128xbf16, #tpu.memory_space<vmem>>, %arg5: memref<8x1xi32, #tpu.memory_space<vmem>>, %arg6: memref<8x1xf32, #tpu.memory_space<vmem>>, %arg7: memref<128x128xbf16, #tpu.memory_space<vmem>>, %arg8: memref<3x8x128xf32, #tpu.memory_space<vmem>>) attributes {dimension_semantics = [#tpu.dimension_semantics<arbitrary>, #tpu.dimension_semantics<arbitrary>], iteration_bounds = array<i64: 3, 3>, scalar_prefetch = 1 : i64, scratch_operands = 2 : i64, tpu.core_type = #tpu.core_type<tc>, window_params = [{pipeline_mode = #tpu.pipeline_mode<synchronous>, transform_indices = @transform_0, window_bounds = array<i64: 24, 128>}, {transform_indices = @transform_1, window_bounds = array<i64: 128, 128>}, {transform_indices = @transform_2, window_bounds = array<i64: 8, 1>}, {transform_indices = @transform_3, window_bounds = array<i64: 8, 1>}]} {
    %c0_i32 = arith.constant 0 : i32
    %0 = arith.cmpi eq, %arg1, %c0_i32 : i32
    %1 = arith.extui %0 : i1 to i32
    %c0_i32_0 = arith.constant 0 : i32
    %2 = arith.cmpi ne, %1, %c0_i32_0 : i32
    scf.if %2 {
      %c0_40 = arith.constant 0 : index
      %c0_41 = arith.constant 0 : index
      %120 = vector.load %arg4[%c0_40, %c0_41] : memref<128x128xbf16, #tpu.memory_space<vmem>>, vector<128x128xbf16>
      %121 = arith.extf %120 : vector<128x128xbf16> to vector<128x128xf32>
      %122 = arith.mulf %121, %121 : vector<128x128xf32>
      %cst_42 = arith.constant dense<0.000000e+00> : vector<128xf32>
      %123 = vector.multi_reduction <add>, %122, %cst_42 [1] : vector<128x128xf32> to vector<128xf32>
      %124 = vector.shape_cast %123 : vector<128xf32> to vector<128x1xf32>
      %cst_43 = arith.constant 1.000000e-30 : f32
      %125 = vector.broadcast %cst_43 : f32 to vector<128x1xf32>
      %126 = arith.maximumf %124, %125 : vector<128x1xf32>
      %127 = math.rsqrt %126 : vector<128x1xf32>
      %128 = vector.broadcast %127 : vector<128x1xf32> to vector<128x128xf32>
      %129 = arith.mulf %121, %128 : vector<128x128xf32>
      %130 = arith.truncf %129 : vector<128x128xf32> to vector<128x128xbf16>
      %c0_44 = arith.constant 0 : index
      %c0_45 = arith.constant 0 : index
      %131 = vector.load %arg7[%c0_44, %c0_45] : memref<128x128xbf16, #tpu.memory_space<vmem>>, vector<128x128xbf16>
      tpu.vector_store %arg7[%c0_44, %c0_45], %130 {strides = array<i32>} : memref<128x128xbf16, #tpu.memory_space<vmem>>, vector<128x128xbf16>,
    } else {
    }
    %c8_i32 = arith.constant 8 : i32
    %3 = arith.muli %arg1, %c8_i32 : i32
    %4 = tpu.assume_multiple %3, 8 : i32
    %5 = arith.index_cast %4 : i32 to index
    %c0 = arith.constant 0 : index
    %6 = vector.load %arg3[%5, %c0] : memref<24x128xbf16, #tpu.memory_space<vmem>>, vector<8x128xbf16>
    %7 = tpu.iota {dimensions = array<i32: 1>} : vector<8x128xi32>
    %c0_i32_1 = arith.constant 0 : i32
    %8 = arith.cmpi eq, %arg0, %c0_i32_1 : i32
    %9 = arith.extui %8 : i1 to i32
    %c0_i32_2 = arith.constant 0 : i32
    %10 = arith.cmpi ne, %9, %c0_i32_2 : i32
    scf.if %10 {
      %120 = arith.extf %6 : vector<8x128xbf16> to vector<8x128xf32>
      %121 = arith.mulf %120, %120 : vector<8x128xf32>
      %cst_40 = arith.constant dense<0.000000e+00> : vector<8xf32>
      %122 = vector.multi_reduction <add>, %121, %cst_40 [1] : vector<8x128xf32> to vector<8xf32>
      %123 = vector.shape_cast %122 : vector<8xf32> to vector<8x1xf32>
      %cst_41 = arith.constant 1.000000e-30 : f32
      %124 = vector.broadcast %cst_41 : f32 to vector<8x1xf32>
      %125 = arith.maximumf %123, %124 : vector<8x1xf32>
      %126 = math.rsqrt %125 : vector<8x1xf32>
      %c0_i32_42 = arith.constant 0 : i32
      %127 = vector.broadcast %c0_i32_42 : i32 to vector<8x128xi32>
      %128 = arith.cmpi eq, %7, %127 : vector<8x128xi32>
      %129 = arith.mulf %125, %126 : vector<8x1xf32>
      %c1_i32 = arith.constant 1 : i32
      %130 = vector.broadcast %c1_i32 : i32 to vector<8x128xi32>
      %131 = arith.cmpi eq, %7, %130 : vector<8x128xi32>
      %c2_i32_43 = arith.constant 2 : i32
      %132 = vector.broadcast %c2_i32_43 : i32 to vector<8x128xi32>
      %133 = arith.cmpi eq, %7, %132 : vector<8x128xi32>
      %cst_44 = arith.constant 0xFF800000 : f32
      %cst_45 = arith.constant 0.000000e+00 : f32
      %134 = vector.broadcast %cst_44 : f32 to vector<8x128xf32>
      %135 = vector.broadcast %cst_45 : f32 to vector<8x128xf32>
      %136 = arith.select %133, %134, %135 : vector<8x128xi1>, vector<8x128xf32>
      %137 = vector.shape_cast %126 : vector<8x1xf32> to vector<8x1xf32>
      %138 = vector.broadcast %137 : vector<8x1xf32> to vector<8x128xf32>
      %139 = arith.select %131, %138, %136 : vector<8x128xi1>, vector<8x128xf32>
      %140 = vector.shape_cast %129 : vector<8x1xf32> to vector<8x1xf32>
      %141 = vector.broadcast %140 : vector<8x1xf32> to vector<8x128xf32>
      %142 = arith.select %128, %141, %139 : vector<8x128xi1>, vector<8x128xf32>
      %143 = arith.index_cast %arg1 : i32 to index
      %c0_46 = arith.constant 0 : index
      %c0_47 = arith.constant 0 : index
      %144 = vector.load %arg8[%143, %c0_46, %c0_47] : memref<3x8x128xf32, #tpu.memory_space<vmem>>, vector<1x8x128xf32>
      %145 = vector.shape_cast %144 : vector<1x8x128xf32> to vector<8x128xf32>
      %146 = vector.shape_cast %142 : vector<8x128xf32> to vector<1x8x128xf32>
      tpu.vector_store %arg8[%143, %c0_46, %c0_47], %146 {strides = array<i32>} : memref<3x8x128xf32, #tpu.memory_space<vmem>>, vector<1x8x128xf32>,
    } else {
    }
    %11 = arith.index_cast %arg1 : i32 to index
    %c0_3 = arith.constant 0 : index
    %c0_4 = arith.constant 0 : index
    %12 = vector.load %arg8[%11, %c0_3, %c0_4] : memref<3x8x128xf32, #tpu.memory_space<vmem>>, vector<1x8x128xf32>
    %13 = vector.shape_cast %12 : vector<1x8x128xf32> to vector<8x128xf32>
    %14 = vector.extract_strided_slice %13 {offsets = [0, 0], sizes = [8, 1], strides = [1, 1]} : vector<8x128xf32> to vector<8x1xf32>
    %15 = vector.extract_strided_slice %13 {offsets = [0, 1], sizes = [8, 1], strides = [1, 1]} : vector<8x128xf32> to vector<8x1xf32>
    %16 = vector.extract_strided_slice %13 {offsets = [0, 2], sizes = [8, 1], strides = [1, 1]} : vector<8x128xf32> to vector<8x1xf32>
    %17 = vector.extract_strided_slice %13 {offsets = [0, 3], sizes = [8, 1], strides = [1, 1]} : vector<8x128xf32> to vector<8x1xf32>
    %18 = vector.extract_strided_slice %13 {offsets = [0, 4], sizes = [8, 1], strides = [1, 1]} : vector<8x128xf32> to vector<8x1xf32>
    %c0_5 = arith.constant 0 : index
    %c0_6 = arith.constant 0 : index
    %19 = vector.load %arg7[%c0_5, %c0_6] : memref<128x128xbf16, #tpu.memory_space<vmem>>, vector<128x128xbf16>
    %cst = arith.constant dense<0.000000e+00> : vector<8x128xf32>
    %20 = tpu.matmul %6, %19, %cst {dimension_numbers = #tpu.dot_dimension_numbers<[1], [1], [0], [0], [0, 0, 1, 0], [], []>} : vector<8x128xbf16>, vector<128x128xbf16>, vector<8x128xf32> -> vector<8x128xf32>
    %cst_7 = arith.constant 0.000000e+00 : f32
    %21 = vector.broadcast %cst_7 : f32 to vector<8x1xf32>
    %22 = arith.subf %21, %14 : vector<8x1xf32>
    %23 = vector.broadcast %22 : vector<8x1xf32> to vector<8x128xf32>
    %24 = arith.maximumf %23, %20 : vector<8x128xf32>
    %25 = vector.broadcast %14 : vector<8x1xf32> to vector<8x128xf32>
    %26 = arith.minimumf %25, %24 : vector<8x128xf32>
    %c0_8 = arith.constant 0 : index
    %c0_9 = arith.constant 0 : index
    %27 = vector.load %arg5[%c0_8, %c0_9] : memref<8x1xi32, #tpu.memory_space<vmem>>, vector<8x1xi32>
    %c128_i32 = arith.constant 128 : i32
    %28 = arith.muli %arg0, %c128_i32 : i32
    %29 = vector.broadcast %28 : i32 to vector<8x1xi32>
    %30 = arith.subi %27, %29 : vector<8x1xi32>
    %c0_i32_10 = arith.constant 0 : i32
    %31 = vector.broadcast %c0_i32_10 : i32 to vector<8x1xi32>
    %32 = arith.cmpi sge, %30, %31 : vector<8x1xi32>
    %c128_i32_11 = arith.constant 128 : i32
    %33 = vector.broadcast %c128_i32_11 : i32 to vector<8x1xi32>
    %34 = arith.cmpi slt, %30, %33 : vector<8x1xi32>
    %35 = arith.andi %32, %34 : vector<8x1xi1>
    %36 = arith.extui %35 : vector<8x1xi1> to vector<8x1xi32>
    %37 = arith.sitofp %36 : vector<8x1xi32> to vector<8x1xf32>
    %38 = tpu.iota {dimensions = array<i32: 1>} : vector<8x128xi32>
    %39 = vector.broadcast %30 : vector<8x1xi32> to vector<8x128xi32>
    %40 = arith.cmpi eq, %38, %39 : vector<8x128xi32>
    %cst_12 = arith.constant 0.000000e+00 : f32
    %41 = vector.broadcast %cst_12 : f32 to vector<8x128xf32>
    %42 = arith.select %40, %26, %41 : vector<8x128xi1>, vector<8x128xf32>
    %cst_13 = arith.constant dense<0.000000e+00> : vector<8xf32>
    %43 = vector.multi_reduction <add>, %42, %cst_13 [1] : vector<8x128xf32> to vector<8xf32>
    %44 = vector.shape_cast %43 : vector<8xf32> to vector<8x1xf32>
    %45 = arith.mulf %44, %15 : vector<8x1xf32>
    %cst_14 = arith.constant -1.000000e+00 : f32
    %cst_15 = arith.constant 1.000000e+00 : f32
    %46 = vector.broadcast %cst_14 : f32 to vector<8x1xf32>
    %47 = arith.maximumf %46, %45 : vector<8x1xf32>
    %48 = vector.broadcast %cst_15 : f32 to vector<8x1xf32>
    %49 = arith.minimumf %48, %47 : vector<8x1xf32>
    %50 = arith.mulf %49, %49 : vector<8x1xf32>
    %cst_16 = arith.constant 8.000000e+00 : f32
    %51 = vector.broadcast %cst_16 : f32 to vector<8x1xf32>
    %52 = arith.mulf %51, %50 : vector<8x1xf32>
    %cst_17 = arith.constant 8.000000e+00 : f32
    %53 = vector.broadcast %cst_17 : f32 to vector<8x1xf32>
    %54 = arith.subf %52, %53 : vector<8x1xf32>
    %55 = arith.mulf %54, %50 : vector<8x1xf32>
    %cst_18 = arith.constant 1.000000e+00 : f32
    %56 = vector.broadcast %cst_18 : f32 to vector<8x1xf32>
    %57 = arith.addf %55, %56 : vector<8x1xf32>
    %cst_19 = arith.constant 0.000000e+00 : f32
    %58 = vector.broadcast %cst_19 : f32 to vector<8x1xf32>
    %cst_20 = arith.constant 1.000000e+00 : f32
    %59 = vector.broadcast %cst_20 : f32 to vector<8x1xf32>
    %cst_21 = arith.constant 0.707106769 : f32
    %60 = vector.broadcast %cst_21 : f32 to vector<8x1xf32>
    %61 = arith.cmpf ole, %49, %60 : vector<8x1xf32>
    %62 = arith.extui %61 : vector<8x1xi1> to vector<8x1xi32>
    %63 = arith.sitofp %62 : vector<8x1xi32> to vector<8x1xf32>
    %64 = arith.addf %58, %63 : vector<8x1xf32>
    %cst_22 = arith.constant 2.000000e+00 : f32
    %65 = vector.broadcast %cst_22 : f32 to vector<8x1xf32>
    %66 = arith.mulf %65, %63 : vector<8x1xf32>
    %cst_23 = arith.constant 1.000000e+00 : f32
    %67 = vector.broadcast %cst_23 : f32 to vector<8x1xf32>
    %68 = arith.subf %67, %66 : vector<8x1xf32>
    %69 = arith.mulf %59, %68 : vector<8x1xf32>
    %cst_24 = arith.constant 6.12323426E-17 : f32
    %70 = vector.broadcast %cst_24 : f32 to vector<8x1xf32>
    %71 = arith.cmpf ole, %49, %70 : vector<8x1xf32>
    %72 = arith.extui %71 : vector<8x1xi1> to vector<8x1xi32>
    %73 = arith.sitofp %72 : vector<8x1xi32> to vector<8x1xf32>
    %74 = arith.addf %64, %73 : vector<8x1xf32>
    %cst_25 = arith.constant 2.000000e+00 : f32
    %75 = vector.broadcast %cst_25 : f32 to vector<8x1xf32>
    %76 = arith.mulf %75, %73 : vector<8x1xf32>
    %cst_26 = arith.constant 1.000000e+00 : f32
    %77 = vector.broadcast %cst_26 : f32 to vector<8x1xf32>
    %78 = arith.subf %77, %76 : vector<8x1xf32>
    %79 = arith.mulf %69, %78 : vector<8x1xf32>
    %cst_27 = arith.constant -0.707106769 : f32
    %80 = vector.broadcast %cst_27 : f32 to vector<8x1xf32>
    %81 = arith.cmpf ole, %49, %80 : vector<8x1xf32>
    %82 = arith.extui %81 : vector<8x1xi1> to vector<8x1xi32>
    %83 = arith.sitofp %82 : vector<8x1xi32> to vector<8x1xf32>
    %84 = arith.addf %74, %83 : vector<8x1xf32>
    %cst_28 = arith.constant 2.000000e+00 : f32
    %85 = vector.broadcast %cst_28 : f32 to vector<8x1xf32>
    %86 = arith.mulf %85, %83 : vector<8x1xf32>
    %cst_29 = arith.constant 1.000000e+00 : f32
    %87 = vector.broadcast %cst_29 : f32 to vector<8x1xf32>
    %88 = arith.subf %87, %86 : vector<8x1xf32>
    %89 = arith.mulf %79, %88 : vector<8x1xf32>
    %cst_30 = arith.constant -1.000000e+00 : f32
    %90 = vector.broadcast %cst_30 : f32 to vector<8x1xf32>
    %91 = arith.cmpf ole, %49, %90 : vector<8x1xf32>
    %92 = arith.extui %91 : vector<8x1xi1> to vector<8x1xi32>
    %93 = arith.sitofp %92 : vector<8x1xi32> to vector<8x1xf32>
    %94 = arith.addf %84, %93 : vector<8x1xf32>
    %cst_31 = arith.constant 2.000000e+00 : f32
    %95 = vector.broadcast %cst_31 : f32 to vector<8x1xf32>
    %96 = arith.mulf %95, %93 : vector<8x1xf32>
    %cst_32 = arith.constant 1.000000e+00 : f32
    %97 = vector.broadcast %cst_32 : f32 to vector<8x1xf32>
    %98 = arith.subf %97, %96 : vector<8x1xf32>
    %99 = arith.mulf %89, %98 : vector<8x1xf32>
    %100 = arith.mulf %99, %57 : vector<8x1xf32>
    %cst_33 = arith.constant 2.000000e+00 : f32
    %101 = vector.broadcast %cst_33 : f32 to vector<8x1xf32>
    %102 = arith.mulf %101, %94 : vector<8x1xf32>
    %103 = arith.subf %100, %102 : vector<8x1xf32>
    %c0_34 = arith.constant 0 : index
    %104 = memref.load %arg2[%c0_34] : memref<1xf32, #tpu.memory_space<smem>>
    %105 = arith.mulf %103, %14 : vector<8x1xf32>
    %106 = arith.subf %105, %44 : vector<8x1xf32>
    %107 = arith.mulf %37, %106 : vector<8x1xf32>
    %108 = vector.broadcast %104 : f32 to vector<8x1xf32>
    %109 = arith.mulf %107, %108 : vector<8x1xf32>
    %110 = arith.addf %44, %109 : vector<8x1xf32>
    %c2_i32 = arith.constant 2 : i32
    %111 = arith.cmpi ne, %arg0, %c2_i32 : i32
    %112 = arith.extui %111 : i1 to i32
    %c0_i32_35 = arith.constant 0 : i32
    %113 = arith.cmpi ne, %112, %c0_i32_35 : i32
    scf.if %113 {
      %cst_40 = arith.constant dense<0xFF800000> : vector<8xf32>
      %120 = vector.multi_reduction <maximumf>, %26, %cst_40 [1] : vector<8x128xf32> to vector<8xf32>
      %121 = vector.shape_cast %120 : vector<8xf32> to vector<8x1xf32>
      %122 = arith.maximumf %16, %121 : vector<8x1xf32>
      %cst_41 = arith.constant 0xFF800000 : f32
      %123 = vector.broadcast %cst_41 : f32 to vector<8x1xf32>
      %124 = arith.select %35, %110, %123 : vector<8x1xi1>, vector<8x1xf32>
      %125 = arith.maximumf %122, %124 : vector<8x1xf32>
      %126 = arith.subf %16, %125 : vector<8x1xf32>
      %127 = math.exp %126 : vector<8x1xf32>
      %128 = arith.mulf %127, %17 : vector<8x1xf32>
      %129 = vector.broadcast %125 : vector<8x1xf32> to vector<8x128xf32>
      %130 = arith.subf %26, %129 : vector<8x128xf32>
      %131 = math.exp %130 : vector<8x128xf32>
      %cst_42 = arith.constant dense<0.000000e+00> : vector<8xf32>
      %132 = vector.multi_reduction <add>, %131, %cst_42 [1] : vector<8x128xf32> to vector<8xf32>
      %133 = vector.shape_cast %132 : vector<8xf32> to vector<8x1xf32>
      %134 = arith.addf %128, %133 : vector<8x1xf32>
      %135 = arith.subf %110, %125 : vector<8x1xf32>
      %136 = math.exp %135 : vector<8x1xf32>
      %137 = arith.subf %44, %125 : vector<8x1xf32>
      %138 = math.exp %137 : vector<8x1xf32>
      %139 = arith.subf %136, %138 : vector<8x1xf32>
      %140 = arith.mulf %37, %139 : vector<8x1xf32>
      %141 = arith.addf %134, %140 : vector<8x1xf32>
      %142 = arith.mulf %37, %110 : vector<8x1xf32>
      %143 = arith.addf %18, %142 : vector<8x1xf32>
      %c2_i32_43 = arith.constant 2 : i32
      %144 = vector.broadcast %c2_i32_43 : i32 to vector<8x128xi32>
      %145 = arith.cmpi eq, %7, %144 : vector<8x128xi32>
      %c3_i32 = arith.constant 3 : i32
      %146 = vector.broadcast %c3_i32 : i32 to vector<8x128xi32>
      %147 = arith.cmpi eq, %7, %146 : vector<8x128xi32>
      %c4_i32 = arith.constant 4 : i32
      %148 = vector.broadcast %c4_i32 : i32 to vector<8x128xi32>
      %149 = arith.cmpi eq, %7, %148 : vector<8x128xi32>
      %150 = vector.shape_cast %143 : vector<8x1xf32> to vector<8x1xf32>
      %151 = vector.broadcast %150 : vector<8x1xf32> to vector<8x128xf32>
      %152 = arith.select %149, %151, %13 : vector<8x128xi1>, vector<8x128xf32>
      %153 = vector.shape_cast %141 : vector<8x1xf32> to vector<8x1xf32>
      %154 = vector.broadcast %153 : vector<8x1xf32> to vector<8x128xf32>
      %155 = arith.select %147, %154, %152 : vector<8x128xi1>, vector<8x128xf32>
      %156 = vector.shape_cast %125 : vector<8x1xf32> to vector<8x1xf32>
      %157 = vector.broadcast %156 : vector<8x1xf32> to vector<8x128xf32>
      %158 = arith.select %145, %157, %155 : vector<8x128xi1>, vector<8x128xf32>
      %159 = arith.index_cast %arg1 : i32 to index
      %c0_44 = arith.constant 0 : index
      %c0_45 = arith.constant 0 : index
      %160 = vector.load %arg8[%159, %c0_44, %c0_45] : memref<3x8x128xf32, #tpu.memory_space<vmem>>, vector<1x8x128xf32>
      %161 = vector.shape_cast %160 : vector<1x8x128xf32> to vector<8x128xf32>
      %162 = vector.shape_cast %158 : vector<8x128xf32> to vector<1x8x128xf32>
      tpu.vector_store %arg8[%159, %c0_44, %c0_45], %162 {strides = array<i32>} : memref<3x8x128xf32, #tpu.memory_space<vmem>>, vector<1x8x128xf32>,
    } else {
    }
    %c2_i32_36 = arith.constant 2 : i32
    %114 = arith.cmpi eq, %arg0, %c2_i32_36 : i32
    %115 = arith.extui %114 : i1 to i32
    %c0_i32_37 = arith.constant 0 : i32
    %116 = arith.cmpi ne, %115, %c0_i32_37 : i32
    scf.if %116 {
      %120 = tpu.iota {dimensions = array<i32: 1>} : vector<1x128xi32>
      %c44_i32 = arith.constant 44 : i32
      %121 = vector.broadcast %c44_i32 : i32 to vector<1x128xi32>
      %122 = arith.cmpi slt, %120, %121 : vector<1x128xi32>
      %cst_40 = arith.constant 0.000000e+00 : f32
      %cst_41 = arith.constant 0xFF800000 : f32
      %123 = vector.broadcast %cst_40 : f32 to vector<1x128xf32>
      %124 = vector.broadcast %cst_41 : f32 to vector<1x128xf32>
      %125 = arith.select %122, %123, %124 : vector<1x128xi1>, vector<1x128xf32>
      %126 = vector.broadcast %125 : vector<1x128xf32> to vector<8x128xf32>
      %127 = arith.addf %26, %126 : vector<8x128xf32>
      %cst_42 = arith.constant dense<0xFF800000> : vector<8xf32>
      %128 = vector.multi_reduction <maximumf>, %127, %cst_42 [1] : vector<8x128xf32> to vector<8xf32>
      %129 = vector.shape_cast %128 : vector<8xf32> to vector<8x1xf32>
      %130 = arith.maximumf %16, %129 : vector<8x1xf32>
      %cst_43 = arith.constant 0xFF800000 : f32
      %131 = vector.broadcast %cst_43 : f32 to vector<8x1xf32>
      %132 = arith.select %35, %110, %131 : vector<8x1xi1>, vector<8x1xf32>
      %133 = arith.maximumf %130, %132 : vector<8x1xf32>
      %134 = arith.subf %16, %133 : vector<8x1xf32>
      %135 = math.exp %134 : vector<8x1xf32>
      %136 = arith.mulf %135, %17 : vector<8x1xf32>
      %137 = vector.broadcast %133 : vector<8x1xf32> to vector<8x128xf32>
      %138 = arith.subf %127, %137 : vector<8x128xf32>
      %139 = math.exp %138 : vector<8x128xf32>
      %cst_44 = arith.constant dense<0.000000e+00> : vector<8xf32>
      %140 = vector.multi_reduction <add>, %139, %cst_44 [1] : vector<8x128xf32> to vector<8xf32>
      %141 = vector.shape_cast %140 : vector<8xf32> to vector<8x1xf32>
      %142 = arith.addf %136, %141 : vector<8x1xf32>
      %143 = arith.subf %110, %133 : vector<8x1xf32>
      %144 = math.exp %143 : vector<8x1xf32>
      %145 = arith.subf %44, %133 : vector<8x1xf32>
      %146 = math.exp %145 : vector<8x1xf32>
      %147 = arith.subf %144, %146 : vector<8x1xf32>
      %148 = arith.mulf %37, %147 : vector<8x1xf32>
      %149 = arith.addf %142, %148 : vector<8x1xf32>
      %150 = arith.mulf %37, %110 : vector<8x1xf32>
      %151 = arith.addf %18, %150 : vector<8x1xf32>
      %c2_i32_45 = arith.constant 2 : i32
      %152 = vector.broadcast %c2_i32_45 : i32 to vector<8x128xi32>
      %153 = arith.cmpi eq, %7, %152 : vector<8x128xi32>
      %c3_i32 = arith.constant 3 : i32
      %154 = vector.broadcast %c3_i32 : i32 to vector<8x128xi32>
      %155 = arith.cmpi eq, %7, %154 : vector<8x128xi32>
      %c4_i32 = arith.constant 4 : i32
      %156 = vector.broadcast %c4_i32 : i32 to vector<8x128xi32>
      %157 = arith.cmpi eq, %7, %156 : vector<8x128xi32>
      %158 = vector.shape_cast %151 : vector<8x1xf32> to vector<8x1xf32>
      %159 = vector.broadcast %158 : vector<8x1xf32> to vector<8x128xf32>
      %160 = arith.select %157, %159, %13 : vector<8x128xi1>, vector<8x128xf32>
      %161 = vector.shape_cast %149 : vector<8x1xf32> to vector<8x1xf32>
      %162 = vector.broadcast %161 : vector<8x1xf32> to vector<8x128xf32>
      %163 = arith.select %155, %162, %160 : vector<8x128xi1>, vector<8x128xf32>
      %164 = vector.shape_cast %133 : vector<8x1xf32> to vector<8x1xf32>
      %165 = vector.broadcast %164 : vector<8x1xf32> to vector<8x128xf32>
      %166 = arith.select %153, %165, %163 : vector<8x128xi1>, vector<8x128xf32>
      %167 = arith.index_cast %arg1 : i32 to index
      %c0_46 = arith.constant 0 : index
      %c0_47 = arith.constant 0 : index
      %168 = vector.load %arg8[%167, %c0_46, %c0_47] : memref<3x8x128xf32, #tpu.memory_space<vmem>>, vector<1x8x128xf32>
      %169 = vector.shape_cast %168 : vector<1x8x128xf32> to vector<8x128xf32>
      %170 = vector.shape_cast %166 : vector<8x128xf32> to vector<1x8x128xf32>
      tpu.vector_store %arg8[%167, %c0_46, %c0_47], %170 {strides = array<i32>} : memref<3x8x128xf32, #tpu.memory_space<vmem>>, vector<1x8x128xf32>,
    } else {
    }
    %c2_i32_38 = arith.constant 2 : i32
    %117 = arith.cmpi eq, %arg0, %c2_i32_38 : i32
    %118 = arith.extui %117 : i1 to i32
    %c0_i32_39 = arith.constant 0 : i32
    %119 = arith.cmpi ne, %118, %c0_i32_39 : i32
    scf.if %119 {
      %120 = arith.index_cast %arg1 : i32 to index
      %c0_40 = arith.constant 0 : index
      %c0_41 = arith.constant 0 : index
      %121 = vector.load %arg8[%120, %c0_40, %c0_41] : memref<3x8x128xf32, #tpu.memory_space<vmem>>, vector<1x8x128xf32>
      %122 = vector.shape_cast %121 : vector<1x8x128xf32> to vector<8x128xf32>
      %123 = vector.extract_strided_slice %122 {offsets = [0, 2], sizes = [8, 1], strides = [1, 1]} : vector<8x128xf32> to vector<8x1xf32>
      %124 = vector.extract_strided_slice %122 {offsets = [0, 3], sizes = [8, 1], strides = [1, 1]} : vector<8x128xf32> to vector<8x1xf32>
      %125 = math.log %124 : vector<8x1xf32>
      %126 = arith.addf %123, %125 : vector<8x1xf32>
      %127 = vector.extract_strided_slice %122 {offsets = [0, 4], sizes = [8, 1], strides = [1, 1]} : vector<8x128xf32> to vector<8x1xf32>
      %128 = arith.subf %126, %127 : vector<8x1xf32>
      %c0_42 = arith.constant 0 : index
      %c0_43 = arith.constant 0 : index
      %129 = vector.load %arg6[%c0_42, %c0_43] : memref<8x1xf32, #tpu.memory_space<vmem>>, vector<8x1xf32>
      tpu.vector_store %arg6[%c0_42, %c0_43], %128 {strides = array<i32>} : memref<8x1xf32, #tpu.memory_space<vmem>>, vector<8x1xf32>,
    } else {
    }
    return
  }
  func.func @transform_0(%arg0: i32, %arg1: i32, %arg2: memref<1xf32, #tpu.memory_space<smem>>) -> (i32, i32) {
    %c0_i32 = arith.constant 0 : i32
    %c0_i32_0 = arith.constant 0 : i32
    %c0_i32_1 = arith.constant 0 : i32
    return %c0_i32, %c0_i32_0 : i32, i32
  }
  func.func @transform_1(%arg0: i32, %arg1: i32, %arg2: memref<1xf32, #tpu.memory_space<smem>>) -> (i32, i32) {
    %c0_i32 = arith.constant 0 : i32
    %c0_i32_0 = arith.constant 0 : i32
    return %arg0, %c0_i32 : i32, i32
  }
  func.func @transform_2(%arg0: i32, %arg1: i32, %arg2: memref<1xf32, #tpu.memory_space<smem>>) -> (i32, i32) {
    %c0_i32 = arith.constant 0 : i32
    %c0_i32_0 = arith.constant 0 : i32
    return %arg1, %c0_i32 : i32, i32
  }
  func.func @transform_3(%arg0: i32, %arg1: i32, %arg2: memref<1xf32, #tpu.memory_space<smem>>) -> (i32, i32) {
    %c0_i32 = arith.constant 0 : i32
    %c0_i32_0 = arith.constant 0 : i32
    return %arg1, %c0_i32 : i32, i32
  }
}

</mosaic_0001>

<bundles_post_ra>
// kernel: tpu_custom_call.1
= control target key start
LH: loop header
LB: loop body
LE: loop exit
PB: predicated region body
PF: predicated region fallthrough
CT: control target
= control target key end

     0   :  { %s1546_s0 = inlined_call_operand.<no memory space> [shape: f32[1], index: 0, kind: input, shape index: {}]   ;;  %s1547_s1 = inlined_call_operand.vmem [shape: bf16[24,128], index: 1, kind: input, shape index: {}]   ;;  %s1548_s2 = inlined_call_operand.hbm [shape: bf16[384,128], index: 2, kind: input, shape index: {}]   ;;  %s1549_s3 = inlined_call_operand.vmem [shape: s32[24,1], index: 3, kind: input, shape index: {}]   ;;  %s1550_s4 = inlined_call_operand.vmem [shape: f32[24,1], index: 4, kind: output, shape index: {}]  }
   0x1   :  { %9 = sst [smem:[#allocation5]] %s1546_s0 }
   0x2   :  { %10 = vsyncpa [#allocation7], 0 }
   0x3   :  { %12 = vsyncpa [#allocation7 + $0x1], 0  ;;  %s1188_s17 = smov 0   ;;  %s1190_s18 = smov 0  }
   0x4   :  { %s1192_s19 = smov 0   ;;  %s1194_s20 = smov 0  }
   0x5   :  { %s1196_s21 = smov 0   ;;  %s1198_s22 = smov 0  }
   0x6   :  { %s1200_s23 = smov 0   ;;  %s1202_s24 = smov 0  }
   0x7 LB: > { %s792_s0 = sadd.s32 4294967295, %s1136_s24   ;;  %s27_s25 = sadd.s32 1, %s1128_s22  ;;  %s1136_s24 = sphi %s1202_s24, %s18_s24   ;;  %s1132_s23 = sphi %s1200_s23, %s1562_s23   ;;  %s1128_s22 = sphi %s1198_s22, %s1561_s22   ;;  %s1124_s21 = sphi %s1196_s21, %s1560_s21   ;;  %s1120_s20 = sphi %s1194_s20, %s1559_s20   ;;  %s1116_s19 = sphi %s1192_s19, %s1558_s19   ;;  %s1112_s18 = sphi %s1190_s18, %s1557_s18   ;;  %s1108_s17 = sphi %s1188_s17, %s1556_s17  }
   0x8   : > { %p28_p0 = scmp.ge.s32.totalorder %s27_s25, 3  ;;  %s30_s26 = sadd.s32 1, %s1132_s23 }
   0x9   : > { %s58_s27 = sadd.s32 1, %s1116_s19  ;;  %p65_p1 = scmp.ne.s32.totalorder %s1116_s19, %s1112_s18 }
   0xa   : > { %s1564_s25 = smov (%p28_p0, %s27_s25), 0  ;;  %s1566_s26 = smov (!%p28_p0, %s30_s26), %s1132_s23 }
   0xb   : > { %p66_p2 = scmp.eq.s32.totalorder %s1136_s24, 0  ;;  %p71_p3 = scmp.ne.s32.totalorder %s1112_s18, %s1108_s17 }
   0xc   : > { %p32_p4 = scmp.ge.s32.totalorder %s1566_s26, 3  ;;  %p72_p5 = scmp.eq.s32.totalorder %s792_s0, 0 }
   0xd   : > { %p1237_p6 = por %p66_p2, %p65_p1  ;;  %p894_p8 = scmp.lt.s32.totalorder %s1136_s24, 9 }
   0xe   : > { %s1568_s26 = smov (%p32_p4, %s1566_s26), 0  ;;  %p1243_p7 = por %p72_p5, %p71_p3 }
   0xf   : > { %s55_s30 = ssub.s32 %s1132_s23, %s1568_s26  ;;  %s150_s5 = sand.u32 1, %s1116_s19  }
  0x10   : > { %p56_p9 = scmp.eq.s32.totalorder %s55_s30, 0  ;;  %s796_s6 = sshll.u32 %s150_s5, 6 }
  0x11   : > { %s819_s7 = sshll.u32 %s1132_s23, 10  ;;  %s154_s12 = scalar_lea.vmem [#allocation6], %s796_s6 }
  0x12   : > { %s1253_s8 = scalar_select %p56_p9, %s1116_s19, %s58_s27  }
  0x13   : > { %s1258_s11 = scalar_lea.hbm %s1548_s2, %s819_s7  ;;  %s161_s13 = sshll.u32 %s154_s12, 4  ;;  %s1266_s13 = int_to_ptr.vmem [resolvable:$true] %s161_s13 }
  0x14   : > { %p1262_p10 = pnand %p894_p8, %p1237_p6  ;;  %s1268_s15 = scalar_lea.sflag [#allocation7], %s150_s5 }
  0x15   : > { %s1040_s16 = scalar_lea.hbm %s1258_s11, 1024  ;;  %s1045_s27 = scalar_lea.hbm %s1548_s2, 3072 }
  0x16   : > { %p1041_p11 = scmp.ne.s32.totalorder %s1258_s11, %s1040_s16  ;;  %p1042_p12 = pneg %p1262_p10 }
  0x17   : > { %p1046_p1 = scmp.lt.u32.totalorder %s1258_s11, %s1548_s2  ;;  %p1047_p2 = scmp.lt.u32.totalorder %s1045_s27, %s1040_s16 }
  0x18   : > { %p1043_p13 = pnand %p1042_p12, %p1041_p11  ;;  %p1049_p4 = scmp.lt.u32.totalorder %s1040_s16, %s1258_s11 }
  0x19   : > { %p1048_p3 = por %p1047_p2, %p1046_p1 }
  0x1a   : > { %p1044_p0 = pneg %p1043_p13 }
  0x1b   : > { %p1050_p5 = por %p1049_p4, %p1048_p3 }
  0x1d   : > { %p1051_p6 = pnand %p1050_p5, %p1044_p0 }
  0x1f   : > { %1054 = shalt.err (!%p1051_p6)
}
  0x20   : > { %s1055_s5 = scalar_lea.vmem %s1266_s13, 1024  ;;  %s1138_s6 = smov [#allocation6]  }
  0x21   : > { %p1056_p8 = scmp.ne.s32.totalorder %s1266_s13, %s1055_s5  ;;  %s1060_s7 = sshll.u32 %s1138_s6, 4  ;;  %s1061_s7 = int_to_ptr.vmem [resolvable:$false] %s1060_s7 }
  0x22   : > { %s1062_s9 = scalar_lea.vmem %s1061_s7, 2048  ;;  %p1063_p13 = scmp.lt.s32.totalorder %s1266_s13, %s1061_s7 }
  0x23   : > { %p1058_p9 = pnand %p1056_p8, %p1042_p12  ;;  %p1064_p1 = scmp.lt.s32.totalorder %s1062_s9, %s1055_s5 }
  0x25   : > { %p1059_p11 = pneg %p1058_p9  ;;  %p1065_p2 = por %p1064_p1, %p1063_p13 }
  0x27   : > { %p1066_p3 = pnand %p1065_p2, %p1059_p11 }
  0x29   : > { %1069 = shalt.err (!%p1066_p3)
}
  0x2a   : > { %s1139_s10 = smov 64   ;;  %s1140_s12 = smov 4  }
  0x2b   : > { %893 = dma.hbm_to_vmem [thread:$0]  (!%p1262_p10), %s1258_s11, 1024, %s1266_s13, %s1268_s15, %s1139_s10, %s1139_s10, %s1140_s12  }
  0x2c   : > { %p799_p12 = scmp.ge.s32.totalorder %s1136_s24, 1  ;;  %p176_p0 = scmp.lt.s32.totalorder %s1136_s24, 10 }
  0x2e   : > { %p177_p4 = pnand %p799_p12, %p176_p0 }
  0x2f   : > { %s182_s16 = sand.u32 (!%p177_p4), 1, %s1112_s18  }
  0x30   : > { %180 = sbr.rel (%p177_p4) target bundleno = 2347 (0x92b), region = 32  ;;  %s800_s17 = sshll.u32 (!%p177_p4), %s182_s16, 6 }
  0x31   : > { %s183_s0 = scalar_lea.sflag (!%p177_p4), [#allocation7], %s182_s16  ;;  %s1299_s27 = scalar_lea.vmem (!%p177_p4), [#allocation6], %s800_s17 }
  0x37   : > { %1103 = dma.done.wait (%p1243_p7), %s183_s0, 1024  }
  0x38   : > { %1105 = vsyncadd (%p1243_p7), %s183_s0, 4294966272  ;;  %p213_p5 = scmp.lt.s32.totalorder %s1120_s20, 2  ;;  %p803_p10 = scmp.ne.s32.totalorder %s1120_s20, 0 }
  0x39   : > { %v852_v0 = vld [vmem:[%s1299_s27 + $0x8] sm:$0xff] (!%p803_p10)   ;;  %v821_v1 = vld [vmem:[%s1299_s27] sm:$0xff] (!%p803_p10)   ;;  %v853_v6 = vld [vmem:[%s1299_s27 + $0x10] sm:$0xff] (!%p803_p10)  }
  0x3a   : > { %s214_s11 = scalar_select %p213_p5, %s1120_s20, 2 }
  0x3b   : > { %225 = sbr.rel (%p803_p10) target bundleno = 252 (0xfc), region = 40  ;;  %v1320_v2 = vunpack.c.l.bf16 (!%p803_p10), %v852_v0  ;;  %v1322_v3 = vunpack.c.l.bf16 (!%p803_p10), %v821_v1  ;;  %v1324_v4 = vunpack.c.h.bf16 (!%p803_p10), %v852_v0  ;;  %v1326_v5 = vunpack.c.h.bf16 (!%p803_p10), %v821_v1  ;;  %v854_v13 = vld [vmem:[%s1299_s27 + $0x18] sm:$0xff] (!%p803_p10)   ;;  %v855_v18 = vld [vmem:[%s1299_s27 + $0x20] sm:$0xff] (!%p803_p10)   ;;  %v856_v23 = vld [vmem:[%s1299_s27 + $0x28] sm:$0xff] (!%p803_p10)  }
  0x3c   : > { %s801_s13 = sshll.u32 %s214_s11, 3  ;;  %v1337_v11 = vunpack.c.h.bf16 (!%p803_p10), %v853_v6  ;;  %v1339_v12 = vunpack.c.l.bf16 (!%p803_p10), %v853_v6  ;;  %v1346_v16 = vunpack.c.h.bf16 (!%p803_p10), %v854_v13  ;;  %v1348_v17 = vunpack.c.l.bf16 (!%p803_p10), %v854_v13  ;;  %v857_v28 = vld [vmem:[%s1299_s27 + $0x30] sm:$0xff] (!%p803_p10)   ;;  %v858_v33 = vld [vmem:[%s1299_s27 + $0x38] sm:$0xff] (!%p803_p10)  }
  0x3d   : > { %s1310_s28 = scalar_lea.vmem %s1549_s3, %s801_s13  ;;  %s1315_s6 = scalar_lea.vmem %s1550_s4, %s801_s13  ;;  %v260_v7 = vmul.f32 (!%p803_p10), %v1320_v2, %v1320_v2  ;;  %v258_v8 = vmul.f32 (!%p803_p10), %v1322_v3, %v1322_v3  ;;  %v261_v9 = vmul.f32 (!%p803_p10), %v1324_v4, %v1324_v4  ;;  %v259_v10 = vmul.f32 (!%p803_p10), %v1326_v5, %v1326_v5 }
  0x3e   : > { %v263_v14 = vmul.f32 (!%p803_p10), %v1337_v11, %v1337_v11  ;;  %v262_v15 = vmul.f32 (!%p803_p10), %v1339_v12, %v1339_v12  ;;  %v265_v19 = vmul.f32 (!%p803_p10), %v1346_v16, %v1346_v16  ;;  %v264_v20 = vmul.f32 (!%p803_p10), %v1348_v17, %v1348_v17 }
  0x3f   : > { %278 = vadd.xlane.f32.xlu1 (!%p803_p10), %v260_v7  ;;  %274 = vadd.xlane.f32.xlu0 (!%p803_p10), %v258_v8  ;;  %v1355_v21 = vunpack.c.h.bf16 (!%p803_p10), %v855_v18  ;;  %v1357_v22 = vunpack.c.l.bf16 (!%p803_p10), %v855_v18  ;;  %v1364_v26 = vunpack.c.h.bf16 (!%p803_p10), %v856_v23  ;;  %v1366_v27 = vunpack.c.l.bf16 (!%p803_p10), %v856_v23 }
  0x40   : > { %v1373_v31 = vunpack.c.h.bf16 (!%p803_p10), %v857_v28  ;;  %v1375_v32 = vunpack.c.l.bf16 (!%p803_p10), %v857_v28  ;;  %v1382_v36 = vunpack.c.h.bf16 (!%p803_p10), %v858_v33  ;;  %v1384_v37 = vunpack.c.l.bf16 (!%p803_p10), %v858_v33 }
  0x41   : > { %v267_v24 = vmul.f32 (!%p803_p10), %v1355_v21, %v1355_v21  ;;  %v266_v25 = vmul.f32 (!%p803_p10), %v1357_v22, %v1357_v22  ;;  %v269_v29 = vmul.f32 (!%p803_p10), %v1364_v26, %v1364_v26  ;;  %v268_v30 = vmul.f32 (!%p803_p10), %v1366_v27, %v1366_v27 }
  0x42   : > { %v271_v34 = vmul.f32 %v1373_v31, %v1373_v31  ;;  %v270_v35 = vmul.f32 %v1375_v32, %v1375_v32  ;;  %v273_v38 = vmul.f32 %v1382_v36, %v1382_v36  ;;  %v272_v39 = vmul.f32 %v1384_v37, %v1384_v37 }
  0x43   : > { %280 = vadd.xlane.f32.xlu1 %v261_v9  ;;  %276 = vadd.xlane.f32.xlu0 %v259_v10 }
  0x47   : > { %284 = vadd.xlane.f32.xlu1 %v263_v14  ;;  %282 = vadd.xlane.f32.xlu0 %v262_v15 }
  0x4b   : > { %288 = vadd.xlane.f32.xlu1 %v265_v19  ;;  %286 = vadd.xlane.f32.xlu0 %v264_v20 }
  0x4f   : > { %292 = vadd.xlane.f32.xlu1 %v267_v24  ;;  %290 = vadd.xlane.f32.xlu0 %v266_v25 }
  0x53   : > { %296 = vadd.xlane.f32.xlu1 %v269_v29  ;;  %294 = vadd.xlane.f32.xlu0 %v268_v30 }
  0x57   : > { %300 = vadd.xlane.f32.xlu1 %v271_v34  ;;  %298 = vadd.xlane.f32.xlu0 %v270_v35 }
  0x5b   : > { %304 = vadd.xlane.f32.xlu1 %v273_v38  ;;  %302 = vadd.xlane.f32.xlu0 %v272_v39 }
  0xcc   : > { %v279_v40 = vpop.xlane.xlu1 %278  ;;  %v275_v41 = vpop.xlane.xlu0 %274 }
  0xcd   : > { %v308_v42 = vmax.f32 %v279_v40, 1e-30  ;;  %v306_v43 = vmax.f32 %v275_v41, 1e-30 }
  0xcf   : > { %980 = vrsqrt.f32 %v308_v42 }
  0xd0   : > { %v281_v44 = vpop.xlane.xlu1 %280  ;;  %v277_v45 = vpop.xlane.xlu0 %276  ;;  %982 = vrsqrt.f32 %v306_v43 }
  0xd1   : > { %v309_v46 = vmax.f32 %v281_v44, 1e-30  ;;  %v307_v47 = vmax.f32 %v277_v45, 1e-30 }
  0xd3   : > { %984 = vrsqrt.f32 %v309_v46 }
  0xd4   : > { %986 = vrsqrt.f32 %v307_v47  ;;  %v285_v48 = vpop.xlane.xlu1 %284  ;;  %v283_v49 = vpop.xlane.xlu0 %282 }
  0xd5   : > { %v311_v50 = vmax.f32 %v285_v48, 1e-30  ;;  %v310_v51 = vmax.f32 %v283_v49, 1e-30 }
  0xd7   : > { %988 = vrsqrt.f32 %v311_v50 }
  0xd8   : > { %990 = vrsqrt.f32 %v310_v51  ;;  %v289_v52 = vpop.xlane.xlu1 %288  ;;  %v287_v53 = vpop.xlane.xlu0 %286 }
  0xd9   : > { %v313_v54 = vmax.f32 %v289_v52, 1e-30  ;;  %v312_v55 = vmax.f32 %v287_v53, 1e-30  ;;  %v981_v56 = vpop.eup %980 }
  0xda   : > { %v983_v57 = vpop.eup %982  ;;  %v340_v0 = vmul.f32 %v981_v56, %v1320_v2 }
  0xdb   : > { %992 = vrsqrt.f32 %v313_v54  ;;  %v338_v6 = vmul.f32 %v983_v57, %v1322_v3 }
  0xdc   : > { %994 = vrsqrt.f32 %v312_v55  ;;  %v293_v58 = vpop.xlane.xlu1 %292  ;;  %v291_v59 = vpop.xlane.xlu0 %290 }
  0xdd   : > { %v985_v60 = vpop.eup %984  ;;  %v315_v61 = vmax.f32 %v293_v58, 1e-30  ;;  %v314_v62 = vmax.f32 %v291_v59, 1e-30 }
  0xde   : > { %v987_v63 = vpop.eup %986  ;;  %v341_v1 = vmul.f32 %v985_v60, %v1324_v4 }
  0xdf   : > { %v339_v7 = vmul.f32 %v987_v63, %v1326_v5  ;;  %996 = vrsqrt.f32 %v315_v61 }
  0xe0   : > { %v355_v8 = vpack.c.bf16 %v341_v1, %v340_v0  ;;  %998 = vrsqrt.f32 %v314_v62  ;;  %v297_v9 = vpop.xlane.xlu1 %296  ;;  %v295_v10 = vpop.xlane.xlu0 %294 }
  0xe1   : > { %v989_v13 = vpop.eup %988  ;;  %v354_v14 = vpack.c.bf16 %v339_v7, %v338_v6  ;;  %v317_v15 = vmax.f32 %v297_v9, 1e-30  ;;  %v316_v18 = vmax.f32 %v295_v10, 1e-30 }
  0xe2   : > { %v991_v19 = vpop.eup %990  ;;  %363 = vst [vmem:[#allocation2 + $0x8] sm:$0xff] %v355_v8  ;;  %v343_v20 = vmul.f32 %v989_v13, %v1337_v11 }
  0xe3   : > { %362 = vst [vmem:[#allocation2] sm:$0xff] %v354_v14  ;;  %v342_v2 = vmul.f32 %v991_v19, %v1339_v12  ;;  %1000 = vrsqrt.f32 %v317_v15 }
  0xe4   : > { %1002 = vrsqrt.f32 %v316_v18  ;;  %v301_v3 = vpop.xlane.xlu1 %300  ;;  %v299_v4 = vpop.xlane.xlu0 %298 }
  0xe5   : > { %v993_v5 = vpop.eup %992  ;;  %v356_v23 = vpack.c.bf16 %v343_v20, %v342_v2  ;;  %v319_v24 = vmax.f32 %v301_v3, 1e-30  ;;  %v318_v25 = vmax.f32 %v299_v4, 1e-30 }
  0xe6   : > { %v995_v28 = vpop.eup %994  ;;  %v345_v29 = vmul.f32 %v993_v5, %v1346_v16 }
  0xe7   : > { %364 = vst [vmem:[#allocation2 + $0x10] sm:$0xff] %v356_v23  ;;  %v344_v30 = vmul.f32 %v995_v28, %v1348_v17  ;;  %1004 = vrsqrt.f32 %v319_v24 }
  0xe8   : > { %1006 = vrsqrt.f32 %v318_v25  ;;  %v305_v11 = vpop.xlane.xlu1 %304  ;;  %v303_v33 = vpop.xlane.xlu0 %302 }
  0xe9   : > { %v997_v34 = vpop.eup %996  ;;  %v357_v12 = vpack.c.bf16 %v345_v29, %v344_v30  ;;  %v321_v35 = vmax.f32 %v305_v11, 1e-30  ;;  %v320_v38 = vmax.f32 %v303_v33, 1e-30 }
  0xea   : > { %v999_v39 = vpop.eup %998  ;;  %v347_v40 = vmul.f32 %v997_v34, %v1355_v21 }
  0xeb   : > { %365 = vst [vmem:[#allocation2 + $0x18] sm:$0xff] %v357_v12  ;;  %v346_v41 = vmul.f32 %v999_v39, %v1357_v22  ;;  %1008 = vrsqrt.f32 %v321_v35 }
  0xec   : > { %1010 = vrsqrt.f32 %v320_v38 }
  0xed   : > { %v1001_v16 = vpop.eup %1000  ;;  %v358_v42 = vpack.c.bf16 %v347_v40, %v346_v41 }
  0xee   : > { %v1003_v43 = vpop.eup %1002  ;;  %v349_v17 = vmul.f32 %v1001_v16, %v1364_v26 }
  0xef   : > { %366 = vst [vmem:[#allocation2 + $0x20] sm:$0xff] %v358_v42  ;;  %v348_v44 = vmul.f32 %v1003_v43, %v1366_v27 }
  0xf1   : > { %v1005_v45 = vpop.eup %1004  ;;  %v359_v46 = vpack.c.bf16 %v349_v17, %v348_v44 }
  0xf2   : > { %v1007_v47 = vpop.eup %1006  ;;  %v351_v48 = vmul.f32 %v1005_v45, %v1373_v31 }
  0xf3   : > { %367 = vst [vmem:[#allocation2 + $0x28] sm:$0xff] %v359_v46  ;;  %v350_v21 = vmul.f32 %v1007_v47, %v1375_v32 }
  0xf5   : > { %v1009_v49 = vpop.eup %1008  ;;  %v360_v22 = vpack.c.bf16 %v351_v48, %v350_v21 }
  0xf6   : > { %v1011_v50 = vpop.eup %1010  ;;  %v353_v51 = vmul.f32 %v1009_v49, %v1382_v36 }
  0xf7   : > { %368 = vst [vmem:[#allocation2 + $0x30] sm:$0xff] %v360_v22  ;;  %v352_v52 = vmul.f32 %v1011_v50, %v1384_v37 }
  0xf9   : > { %v361_v26 = vpack.c.bf16 %v353_v51, %v352_v52 }
  0xfb   : > { %369 = vst [vmem:[#allocation2 + $0x38] sm:$0xff] %v361_v26 }
  0xfc PF: > { %s1407_s29 = sshll.u32 %s1120_s20, 3  ;;  %v376_v27 = vlaneseq  ;;  %p806_p7 = scmp.ne.s32.totalorder %s1124_s21, 0 }
  0xfd   : > { %s371_s7 = sshra.s32 %s1407_s29, 3  ;;  %v1141_v55 = vmov (!%p806_p7), 0.0   ;;  %s395_s20 = scalar_lea.vmem (!%p806_p7), [#allocation3], %s1407_s29 }
  0xfe   : > { %s805_s9 = sshll.u32 %s371_s7, 2  ;;  %v1410_v31 = vand.u32 127, %v376_v27  ;;  %381 = sbr.rel (%p806_p7) target bundleno = 420 (0x1a4), region = 44 }
  0xff   : > { %s374_s16 = scalar_lea.vmem %s1547_s1, %s805_s9 }
 0x100   : > { %v375_v32 = vld [vmem:[%s374_s16] sm:$0xf]  ;;  %vm391_vm0 = vcmp.eq.s32.totalorder (!%p806_p7), %v1410_v31, 2  ;;  %vm390_vm1 = vcmp.eq.s32.totalorder (!%p806_p7), %v1410_v31, 1  ;;  %vm388_vm2 = vcmp.eq.s32.totalorder (!%p806_p7), %v1410_v31, 0 }
 0x101   : > { %v382_v36 = vunpack.c.l.bf16 (!%p806_p7), %v375_v32  ;;  %v392_v56 = vsel (!%p806_p7), %vm391_vm0, -inf, %v1141_v55 }
 0x103   : > { %v383_v37 = vmul.f32 (!%p806_p7), %v382_v36, %v382_v36 }
 0x105   : > { %384 = vadd.xlane.f32.xlu0 %v383_v37 }
 0x192   : > { %v385_v53 = vpop.xlane.xlu0 %384 }
 0x193   : > { %v386_v54 = vmax.f32 %v385_v53, 1e-30 }
 0x195   : > { %1012 = vrsqrt.f32 %v386_v54 }
 0x19f   : > { %v1013_v57 = vpop.eup %1012 }
 0x1a0   : > { %v389_v58 = vmul.f32 %v1013_v57, %v386_v54  ;;  %v393_v59 = vsel %vm390_vm1, %v1013_v57, %v392_v56 }
 0x1a2   : > { %v394_v60 = vsel %vm388_vm2, %v389_v58, %v393_v59 }
 0x1a3   : > { %396 = vst [vmem:[%s395_s20] sm:$0xff] %v394_v60 }
 0x1a4 PF: > { %v399_v61 = vld [vmem:[#allocation2] sm:$0xff]  ;;  %v1142_v62 = vmov 0.0   ;;  %vm1143_vm3 = vmmov 0   ;;  %s807_s17 = sshll.u32 %s1124_s21, 7  ;;  %v1144_v63 = vmov 0   ;;  %s1424_s0 = scalar_lea.vmem [#allocation3], %s1407_s29 }
 0x1a5   : > { %868 = vmatprep.subr.bf16.mxu0 %v1142_v62  ;;  %884 = vmatprep.mubr.msk.bf16.mxu0 %vm1143_vm3, %v1142_v62  ;;  %v462_v1 = vstv %s807_s17  ;;  %v460_v7 = vld [vmem:[%s1310_s28] sm:$0xff]  ;;  %v400_v9 = vld [vmem:[#allocation2 + $0x8] sm:$0xff]  ;;  %v401_v10 = vld [vmem:[#allocation2 + $0x10] sm:$0xff]  ;;  %s1145_s27 = smov 1   ;;  %s1146_s11 = smov 127  }
 0x1a6   : > { %869 = vmatpush3.bf16.xpose.msra.mxu0 %v399_v61  ;;  %1014 = vset.pattern.permute.xlu0 %v1144_v63  ;;  %v1432_v8 = vsub.s32 %v460_v7, %v462_v1  ;;  %v402_v13 = vld [vmem:[#allocation2 + $0x18] sm:$0xff]  ;;  %v403_v14 = vld [vmem:[#allocation2 + $0x20] sm:$0xff]  ;;  %v404_v15 = vld [vmem:[#allocation2 + $0x28] sm:$0xff]  ;;  %s514_s13 = sld [smem:[#allocation5]]  ;;  %p815_p6 = scmp.eq.s32.totalorder %s1124_s21, 2 }
 0x1a7   : > { %870 = vmatprep.subr.bf16.mxu0 %v1142_v62  ;;  %1015 = vset.pattern.permute.xlu1 %v1144_v63  ;;  %v405_v18 = vld [vmem:[#allocation2 + $0x30] sm:$0xff]  ;;  %v406_v19 = vld [vmem:[#allocation2 + $0x38] sm:$0xff]  ;;  %v1147_v1 = vmov (!%p815_p6), 2   ;;  %s1148_s14 = smov (!%p815_p6), 2   ;;  %s1149_s15 = smov (!%p815_p6), 127   ;;  %vm587_vm12 = vcmp.eq.s32.totalorder (!%p815_p6), %v1410_v31, 4 }
 0x1a8   : > { %470 = vperm.xlu1 %1015, %v1432_v8   ;;  %vm464_vm9 = vcmp.ge.s32.totalorder %v1432_v8, 0  ;;  %vm465_vm10 = vcmp.lt.s32.totalorder %v1432_v8, 128  ;;  %s1150_s28 = smov (!%p815_p6), 126   ;;  %s1151_s30 = smov (!%p815_p6), 4   ;;  %vm586_vm13 = vcmp.eq.s32.totalorder (!%p815_p6), %v1410_v31, 3  ;;  %vm585_vm14 = vcmp.eq.s32.totalorder (!%p815_p6), %v1410_v31, 2 }
 0x1a9   : > { %vm1458_vm11 = vmand %vm464_vm9, %vm465_vm10 }
 0x1aa   : > { %v1427_v0 = vld [vmem:[%s1424_s0] sm:$0xff]  ;;  %v1465_v56 = vsel %vm1458_vm11, 1.0, %v1142_v62 }
 0x1ab   : > { %v447_v6 = vsub.f32 0.0, %v1427_v0 }
 0x1ac   : > { %v525_v57 = vstv %s514_s13  ;;  %1016 = vset.pattern.permute.xlu1 (!%p815_p6), %v1147_v1 }
 0x1ad   : > { %450 = vperm.xlu0 %1014, %v447_v6  }
 0x1ae   : > { %871 = vmatpush3.bf16.xpose.msra.mxu0 %v400_v9 }
 0x1af   : > { %872 = vmatprep.subr.bf16.mxu0 %v1142_v62 }
 0x1b1   : > { %456 = vperm.xlu0 %1014, %v1427_v0  }
 0x1b5   : > { %515 = vrot.lane.b32.xlu0 %v1427_v0, %s1145_s27 }
 0x1b6   : > { %873 = vmatpush3.bf16.xpose.msra.mxu0 %v401_v10 }
 0x1b7   : > { %874 = vmatprep.subr.bf16.mxu0 %v1142_v62 }
 0x1be   : > { %875 = vmatpush3.bf16.xpose.msra.mxu0 %v402_v13 }
 0x1bf   : > { %876 = vmatprep.subr.bf16.mxu0 %v1142_v62 }
 0x1c6   : > { %877 = vmatpush3.bf16.xpose.msra.mxu0 %v403_v14 }
 0x1c7   : > { %878 = vmatprep.subr.bf16.mxu0 %v1142_v62 }
 0x1ce   : > { %879 = vmatpush3.bf16.xpose.msra.mxu0 %v404_v15 }
 0x1cf   : > { %880 = vmatprep.subr.bf16.mxu0 %v1142_v62 }
 0x1d6   : > { %881 = vmatpush3.bf16.xpose.msra.mxu0 %v405_v18 }
 0x1d7   : > { %882 = vmatprep.subr.bf16.mxu0 %v1142_v62 }
 0x1de   : > { %883 = vmatpush3.bf16.xpose.msra.mxu0 %v406_v19 }
 0x1e5   : > { %885 = vmatmul.mubr.bf16.vlgmr.msra.gmra.mrb[0].mxu0 %v375_v32 }
 0x227   : > { %v471_v2 = vpop.permute.xlu1 %470 }
 0x228   : > { %vm472_vm4 = vcmp.eq.s32.totalorder %v1410_v31, %v471_v2 }
 0x22c   : > { %v451_v20 = vpop.permute.xlu0 %450 }
 0x230   : > { %v457_v23 = vpop.permute.xlu0 %456 }
 0x234   : > { %v516_v36 = vpop.permute.xlu0 %515 }
 0x2b8   : > { %v441_v3 = vpop.f32.mrb[0].mxu0 }
 0x2b9   : > { %v453_v4 = vmax.f32 %v451_v20, %v441_v3  ;;  %v886_v5 = vpop.f32.mrb[1].mxu0 }
 0x2ba   : > { %v444_v24 = vpop.f32.mrb[2].mxu0 }
 0x2bb   : > { %v887_v25 = vpop.f32.mrb[3].mxu0  ;;  %v1444_v28 = vmin.f32 %v457_v23, %v453_v4  ;;  %v1152_v4 = vmov (!%p815_p6), 4  }
 0x2bc   : > { %1017 = vset.pattern.permute.xlu0 (!%p815_p6), %v1152_v4 }
 0x2bd   : > { %v473_v29 = vsel %vm472_vm4, %v1444_v28, 0.0 }
 0x2be   : > { %474 = vadd.xlane.f32.xlu1 %v473_v29 }
 0x34b   : > { %v1447_v30 = vpop.xlane.xlu1 %474 }
 0x34c   : > { %v476_v11 = vmul.f32 %v1447_v30, %v1427_v0 }
 0x34e   : > { %v809_v33 = vclamps-f32 %v476_v11, 1.0 }
 0x350   : > { %v479_v34 = vmul.f32 %v809_v33, %v809_v33  ;;  %vm484_vm5 = vcmp.le.f32.partialorder %v809_v33, 0.70710677  ;;  %vm490_vm6 = vcmp.le.f32.partialorder %v809_v33, 6.123234e-17  ;;  %vm497_vm7 = vcmp.le.f32.partialorder %v809_v33, -0.70710677 }
 0x351   : > { %v811_v12 = vsel %vm484_vm5, 1.0, %v1142_v62  ;;  %v812_v35 = vsel %vm490_vm6, 1.0, %v1142_v62  ;;  %v813_v38 = vsel %vm497_vm7, 1.0, %v1142_v62  ;;  %vm504_vm8 = vcmp.le.f32.partialorder %v809_v33, -1.0 }
 0x352   : > { %v480_v39 = vmul.f32 8.0, %v479_v34  ;;  %v488_v40 = vmul.f32 2.0, %v811_v12  ;;  %v493_v41 = vadd.f32 %v812_v35, %v811_v12  ;;  %v494_v16 = vmul.f32 2.0, %v812_v35 }
 0x353   : > { %v501_v42 = vmul.f32 2.0, %v813_v38  ;;  %v814_v43 = vsel %vm504_vm8, 1.0, %v1142_v62 }
 0x354   : > { %v810_v17 = vadd.f32 -8.0, %v480_v39  ;;  %v489_v44 = vsub.f32 1.0, %v488_v40  ;;  %v495_v45 = vsub.f32 1.0, %v494_v16  ;;  %v500_v46 = vadd.f32 %v813_v38, %v493_v41 }
 0x355   : > { %v508_v47 = vmul.f32 2.0, %v814_v43  ;;  %v502_v49 = vsub.f32 1.0, %v501_v42 }
 0x356   : > { %v482_v48 = vmul.f32 %v810_v17, %v479_v34  ;;  %v496_v21 = vmul.f32 %v495_v45, %v489_v44  ;;  %v507_v50 = vadd.f32 %v814_v43, %v500_v46 }
 0x357   : > { %v509_v51 = vsub.f32 1.0, %v508_v47 }
 0x358   : > { %v503_v22 = vmul.f32 %v502_v49, %v496_v21  ;;  %v483_v52 = vadd.f32 1.0, %v482_v48  ;;  %v512_v32 = vmul.f32 2.0, %v507_v50 }
 0x35a   : > { %v510_v26 = vmul.f32 %v509_v51, %v503_v22 }
 0x35c   : > { %v511_v27 = vmul.f32 %v510_v26, %v483_v52 }
 0x35e   : > { %v513_v37 = vsub.f32 %v511_v27, %v512_v32 }
 0x360   : > { %v518_v53 = vmul.f32 %v516_v36, %v513_v37 }
 0x362   : > { %v519_v54 = vsub.f32 %v518_v53, %v1447_v30 }
 0x364   : > { %521 = vrot.lane.b32.xlu0 %v519_v54, %s1146_s11 }
 0x383   : > { %532 = vmax.xlane.f32.xlu0 (!%p815_p6), %v1444_v28 }
 0x3d5   : > { %531 = sbr.rel (%p815_p6) target bundleno = 1527 (0x5f7), region = 48 }
 0x3d6   : > { %v522_v58 = vpop.permute.xlu0 %521 }
 0x3d7   : > { %v524_v59 = vmul.f32 %v1465_v56, %v522_v58 }
 0x3d9   : > { %v526_v60 = vmul.f32 %v525_v57, %v524_v59 }
 0x3db   : > { %v1469_v61 = vadd.f32 %v526_v60, %v1447_v30 }
 0x3dd   : > { %v535_v63 = vsel %vm1458_vm11, %v1469_v61, -inf  ;;  %v579_v14 = vmul.f32 %v1465_v56, %v1469_v61 }
 0x3de   : > { %537 = vrot.lane.b32.xlu0 %v535_v63, %s1148_s14 }
 0x3e2   : > { %544 = vrot.lane.b32.xlu0 %v1427_v0, %s1149_s15 }
 0x3e6   : > { %581 = vrot.lane.b32.xlu0 %v579_v14, %s1151_s30 }
 0x410   : > { %v533_v62 = vpop.xlane.xlu0 %532 }
 0x411   : > { %v534_v6 = vmax.f32 %v1427_v0, %v533_v62 }
 0x450   : > { %v538_v7 = vpop.permute.xlu0 %537 }
 0x451   : > { %v540_v8 = vmax.f32 %v534_v6, %v538_v7 }
 0x453   : > { %v565_v9 = vsub.f32 %v1447_v30, %v540_v8  ;;  %550 = vperm.xlu1 %1016, %v540_v8   ;;  %v541_v12 = vsub.f32 %v1427_v0, %v540_v8 }
 0x454   : > { %v545_v24 = vpop.permute.xlu0 %544 }
 0x455   : > { %v566_v10 = vmul.f32 1.442695, %v565_v9  ;;  %v542_v35 = vmul.f32 1.442695, %v541_v12 }
 0x457   : > { %559 = vrot.lane.b32.xlu1 %v540_v8, %s1150_s28  ;;  %1019 = vpow2.f32 %v566_v10 }
 0x458   : > { %v582_v33 = vpop.permute.xlu0 %581 }
 0x459   : > { %v584_v34 = vadd.f32 %v582_v33, %v1427_v0 }
 0x461   : > { %v1020_v13 = vpop.eup %1019 }
 0x462   : > { %569 = vrot.lane.b32.xlu1 %v1020_v13, %s1150_s28 }
 0x4d2   : > { %v551_v15 = vpop.permute.xlu1 %550 }
 0x4d3   : > { %v553_v18 = vsub.f32 %v1444_v28, %v551_v15 }
 0x4d5   : > { %v554_v19 = vmul.f32 1.442695, %v553_v18 }
 0x4d6   : > { %v560_v20 = vpop.permute.xlu1 %559 }
 0x4d7   : > { %1021 = vpow2.f32 %v554_v19  ;;  %v562_v2 = vsub.f32 %v1469_v61, %v560_v20 }
 0x4d9   : > { %v563_v3 = vmul.f32 1.442695, %v562_v2 }
 0x4da   : > { %v570_v25 = vpop.permute.xlu1 %569 }
 0x4db   : > { %1023 = vpow2.f32 %v563_v3 }
 0x4dc   : > { %1025 = vpow2.f32 %v542_v35 }
 0x4e1   : > { %v1022_v5 = vpop.eup %1021 }
 0x4e2   : > { %556 = vadd.xlane.f32.xlu1 %v1022_v5 }
 0x4e5   : > { %v1024_v23 = vpop.eup %1023 }
 0x4e6   : > { %v572_v29 = vsub.f32 %v1024_v23, %v570_v25  ;;  %v1026_v38 = vpop.eup %1025 }
 0x4e7   : > { %v547_v39 = vmul.f32 %v1026_v38, %v545_v24 }
 0x4e8   : > { %v573_v11 = vmul.f32 %v1465_v56, %v572_v29 }
 0x4ea   : > { %575 = vrot.lane.b32.xlu0 %v573_v11, %s1148_s14 }
 0x4ee   : > { %590 = vperm.xlu0 %1017, %v584_v34  }
 0x4f2   : > { %1018 = vset.pattern.permute.xlu0 %v1147_v1 }
 0x55c   : > { %v576_v16 = vpop.permute.xlu0 %575 }
 0x56d   : > { %v591_v43 = vpop.permute.xlu0 %590 }
 0x56e   : > { %v593_v17 = vsel %vm587_vm12, %v591_v43, %v1427_v0 }
 0x56f   : > { %v557_v40 = vpop.xlane.xlu1 %556 }
 0x570   : > { %v558_v41 = vadd.f32 %v557_v40, %v547_v39 }
 0x572   : > { %v578_v42 = vadd.f32 %v576_v16, %v558_v41 }
 0x574   : > { %596 = vperm.xlu0 %1018, %v578_v42  }
 0x5f3   : > { %v597_v44 = vpop.permute.xlu0 %596 }
 0x5f4   : > { %v599_v45 = vsel %vm586_vm13, %v597_v44, %v593_v17 }
 0x5f5   : > { %v600_v46 = vsel %vm585_vm14, %v551_v15, %v599_v45 }
 0x5f6   : > { %601 = vst [vmem:[%s1424_s0] sm:$0xff] %v600_v46 }
 0x5f7 PF: > { %p816_p8 = scmp.ne.s32.totalorder %s1124_s21, 2 }
 0x5f8   : > { %vm606_vm15 = vcmp.lt.s32.totalorder (!%p816_p8), %v1410_v31, 44  ;;  %v1153_v47 = vmov (!%p816_p8), -inf   ;;  %v612_v49 = vsel (!%p816_p8), %vm1458_vm11, %v1469_v61, -inf  ;;  %v1154_v22 = vmov (!%p816_p8), 2   ;;  %s1155_s5 = smov (!%p816_p8), 2   ;;  %s1156_s29 = smov (!%p816_p8), 127  }
 0x5f9   : > { %605 = sbr.rel (%p816_p8) target bundleno = 2347 (0x92b), region = 52  ;;  %v607_v48 = vsel (!%p816_p8), %vm606_vm15, 0.0, %v1153_v47  ;;  %1027 = vset.pattern.permute.xlu1 (!%p816_p8), %v1154_v22  ;;  %s1157_s21 = smov (!%p816_p8), 126   ;;  %v656_v36 = vmul.f32 (!%p816_p8), %v1465_v56, %v1469_v61  ;;  %v1159_v58 = vmov (!%p816_p8), 4   ;;  %vm664_vm0 = vcmp.eq.s32.totalorder (!%p816_p8), %v1410_v31, 4 }
 0x5fa   : > { %v608_v21 = vadd.f32 (!%p816_p8), %v607_v48, %v1444_v28  ;;  %s1158_s7 = smov (!%p816_p8), 4   ;;  %1028 = vset.pattern.permute.xlu0 (!%p816_p8), %v1159_v58  ;;  %vm663_vm1 = vcmp.eq.s32.totalorder (!%p816_p8), %v1410_v31, 3  ;;  %vm662_vm2 = vcmp.eq.s32.totalorder (!%p816_p8), %v1410_v31, 2  ;;  %vm696_vm3 = vcmask (!%p816_p8), 7168  }
 0x5fc   : > { %609 = vmax.xlane.f32.xlu0 (!%p816_p8), %v608_v21 }
 0x612   : > { %614 = vrot.lane.b32.xlu0 %v612_v49, %s1155_s5 }
 0x616   : > { %621 = vrot.lane.b32.xlu0 %v1427_v0, %s1156_s29 }
 0x61a   : > { %658 = vrot.lane.b32.xlu0 %v656_v36, %s1158_s7 }
 0x689   : > { %v610_v50 = vpop.xlane.xlu0 %609 }
 0x68a   : > { %v611_v51 = vmax.f32 %v1427_v0, %v610_v50 }
 0x68d   : > { %v615_v52 = vpop.permute.xlu0 %614 }
 0x68e   : > { %v617_v26 = vmax.f32 %v611_v51, %v615_v52 }
 0x690   : > { %v642_v28 = vsub.f32 %v1447_v30, %v617_v26  ;;  %627 = vperm.xlu1 %1027, %v617_v26  }
 0x691   : > { %v622_v63 = vpop.permute.xlu0 %621 }
 0x692   : > { %v643_v27 = vmul.f32 1.442695, %v642_v28 }
 0x694   : > { %636 = vrot.lane.b32.xlu1 %v617_v26, %s1157_s21  ;;  %1030 = vpow2.f32 %v643_v27 }
 0x695   : > { %v659_v7 = vpop.permute.xlu0 %658 }
 0x696   : > { %v661_v8 = vadd.f32 %v659_v7, %v1427_v0 }
 0x69e   : > { %v1031_v32 = vpop.eup %1030 }
 0x69f   : > { %646 = vrot.lane.b32.xlu1 %v1031_v32, %s1157_s21 }
 0x70f   : > { %v628_v37 = vpop.permute.xlu1 %627 }
 0x710   : > { %v630_v53 = vsub.f32 %v608_v21, %v628_v37 }
 0x712   : > { %v631_v54 = vmul.f32 1.442695, %v630_v53 }
 0x713   : > { %v637_v55 = vpop.permute.xlu1 %636 }
 0x714   : > { %1032 = vpow2.f32 %v631_v54  ;;  %v639_v30 = vsub.f32 %v1469_v61, %v637_v55  ;;  %v618_v61 = vsub.f32 %v1427_v0, %v617_v26 }
 0x716   : > { %v640_v57 = vmul.f32 1.442695, %v639_v30  ;;  %v619_v9 = vmul.f32 1.442695, %v618_v61 }
 0x717   : > { %v647_v1 = vpop.permute.xlu1 %646 }
 0x718   : > { %1034 = vpow2.f32 %v640_v57 }
 0x719   : > { %1036 = vpow2.f32 %v619_v9 }
 0x71e   : > { %v1033_v59 = vpop.eup %1032 }
 0x71f   : > { %633 = vadd.xlane.f32.xlu1 %v1033_v59 }
 0x722   : > { %v1035_v60 = vpop.eup %1034 }
 0x723   : > { %v649_v62 = vsub.f32 %v1035_v60, %v647_v1  ;;  %v1037_v10 = vpop.eup %1036 }
 0x724   : > { %v624_v13 = vmul.f32 %v1037_v10, %v622_v63 }
 0x725   : > { %v650_v6 = vmul.f32 %v1465_v56, %v649_v62 }
 0x727   : > { %652 = vrot.lane.b32.xlu0 %v650_v6, %s1155_s5 }
 0x72b   : > { %667 = vperm.xlu0 %1028, %v661_v8  }
 0x72f   : > { %1029 = vset.pattern.permute.xlu0 %v1154_v22 }
 0x799   : > { %v653_v18 = vpop.permute.xlu0 %652 }
 0x7aa   : > { %v668_v56 = vpop.permute.xlu0 %667 }
 0x7ab   : > { %v670_v20 = vsel %vm664_vm0, %v668_v56, %v1427_v0 }
 0x7ac   : > { %v634_v14 = vpop.xlane.xlu1 %633 }
 0x7ad   : > { %v635_v15 = vadd.f32 %v634_v14, %v624_v13 }
 0x7af   : > { %v655_v19 = vadd.f32 %v653_v18, %v635_v15 }
 0x7b1   : > { %673 = vperm.xlu0 %1029, %v655_v19  }
 0x830   : > { %v674_v2 = vpop.permute.xlu0 %673 }
 0x831   : > { %v676_v3 = vsel %vm663_vm1, %v674_v2, %v670_v20 }
 0x832   : > { %v677_v4 = vsel %vm662_vm2, %v628_v37, %v676_v3 }
 0x833   : > { %678 = vst [vmem:[%s1424_s0] sm:$0xff] %v677_v4  ;;  %688 = vrot.lane.b32.xlu0 %v677_v4, %s1157_s21  ;;  %1038 = vlog2.f32 %v677_v4 }
 0x83d   : > { %v1039_v5 = vpop.eup %1038 }
 0x83e   : > { %v681_v23 = vmul.f32 0.6931472, %v1039_v5 }
 0x840   : > { %683 = vrot.lane.b32.xlu1 %v681_v23, %s1156_s29 }
 0x8a5   : > { %v689_v29 = vpop.permute.xlu0 %688 }
 0x8b2   : > { %v684_v24 = vpop.permute.xlu1 %683 }
 0x8b3   : > { %v686_v25 = vadd.f32 %v684_v24, %v677_v4 }
 0x8b5   : > { %v691_v11 = vsub.f32 %v686_v25, %v689_v29 }
 0x8b7   : > { %693 = vrot.lane.b32.xlu0 %v691_v11, %s1157_s21 }
 0x929   : > { %v694_v31 = vpop.permute.xlu0 %693 }
 0x92a   : > { %697 = vst.msk [vmem:[%s1315_s6] sm:$0xff] %vm696_vm3, %v694_v31 }
 0x92b PF: > { %s18_s24 = sadd.s32 1, %s1136_s24   ;;  %s1556_s17 = smov %s1112_s18 }
 0x92c   : > { %p15_p9 = scmp.ge.s32.totalorder %s18_s24, 11   ;;  %s1557_s18 = smov %s1116_s19 }
 0x92d   : > { %s1558_s19 = smov %s1253_s8  ;;  %s1559_s20 = smov %s1128_s22 }
 0x92e   : > { %s1560_s21 = smov %s1132_s23  ;;  %s1561_s22 = smov %s1564_s25 }
 0x92f   : > { %s1562_s23 = smov %s1568_s26  ;;  %17 = sbr.rel (!%p15_p9) target bundleno = 7 (0x7), region = 94 }
 0x936   :  { %717 = vsyncpa [#allocation7], 1 }
 0x937   :  { %719 = vsyncpa [#allocation7 + $0x1], 1 }

</bundles_post_ra>
